<compile_context>
chip_gen: v7x
topology: tpu7x:2x2x1
jax: 0.10.0
libtpu: 0.0.40
codegen_flags: <defaults>
</compile_context>

<pallas_src>
import functools

import jax
import jax.numpy as jnp
from jax.experimental import pallas as pl
from jax.experimental.pallas import tpu as pltpu


def _cdiv(a, b):
    return -(-a // b)


def _round_up(a, b):
    return _cdiv(a, b) * b


def _integral_cost_kernel(*refs, compute_state, compute_term, compute_ctrl,
                          u_star, rows_blk, rows_x, rows_u, term_start):
    """Per-block partial sums of un-weighted row norms.

    Output block (1, 8, 128) is the per-core accumulator:
      row 0 lane 0 : sum ||x - x_star||   over valid rows      (state)
      row 1 lane 0 : sum ||x - x_star||   over terminal rows   (terminal)
      row 2 lane 0 : sum ||u - u_star||   over valid rows      (control)
    """
    idx = 0
    if compute_state or compute_term:
        xs_ref, x_ref = refs[idx], refs[idx + 1]
        idx += 2
    if compute_ctrl:
        u_ref = refs[idx]
        idx += 1
    o_ref = refs[idx]

    c = pl.program_id(0)           # core / parallel chunk
    b = pl.program_id(1)           # row-block within the chunk (arbitrary)
    nb = pl.num_programs(1)

    @pl.when(b == 0)
    def _init():
        o_ref[...] = jnp.zeros_like(o_ref)

    # Global row index of each row in this block (for padding / terminal masks).
    base = (c * nb + b) * rows_blk
    row = jax.lax.broadcasted_iota(jnp.int32, (rows_blk, 1), 0) + base
    slot = jax.lax.broadcasted_iota(jnp.int32, (8, 128), 0)

    contrib = jnp.zeros((8, 128), jnp.float32)

    if compute_state or compute_term:
        x = x_ref[...].astype(jnp.float32)                    # (rows_blk, D)
        xs = xs_ref[...].astype(jnp.float32)                  # (1, D)
        d = x - xs
        # Weights are factored out: ||Q*(x-xs)|| = |Q| * ||x-xs|| (applied in wrapper).
        norms = jnp.sqrt(jnp.sum(d * d, axis=-1, keepdims=True))   # (rows_blk, 1)
        valid_x = row < rows_x
        if compute_state:
            s = jnp.sum(jnp.where(valid_x, norms, 0.0))
            contrib = contrib + jnp.where(slot == 0, s, 0.0)
        if compute_term:
            tmask = valid_x & (row >= term_start)
            t = jnp.sum(jnp.where(tmask, norms, 0.0))
            contrib = contrib + jnp.where(slot == 1, t, 0.0)

    if compute_ctrl:
        u = u_ref[...].astype(jnp.float32)                    # (rows_blk, M)
        du = u - u_star
        unorms = jnp.sqrt(jnp.sum(du * du, axis=-1, keepdims=True))
        valid_u = row < rows_u
        cs = jnp.sum(jnp.where(valid_u, unorms, 0.0))
        contrib = contrib + jnp.where(slot == 2, cs, 0.0)

    o_ref[0] = o_ref[0] + contrib


def integral_cost(x, x_star, u=None, *, P=0.0, Q=1.0, R=0.0, u_star=0.0,
                  block_rows=2048):
    """Pallas implementation of IntegralCost.forward.

    x: (T, B, D) trajectories, x_star: (D,) target, u: (T, B, M) controls.
    P, Q, R, u_star are Python scalars (as in the module __init__ defaults).
    Returns a scalar float32 cost.
    """
    # TODO(synk): tensor-valued P/Q/R weights are not supported (scalars only).
    P, Q, R, u_star = float(P), float(Q), float(R), float(u_star)
    x = jnp.asarray(x)
    T, B = int(x.shape[0]), int(x.shape[1])
    D = int(x.shape[-1])

    need_x = (P != 0.0) or (Q != 0.0)
    need_u = (R != 0.0) and (u is not None)

    extra = jnp.float32(0.0)
    if R != 0.0 and u is None:
        # PyTorch default u = torch.Tensor([0.0]): mean ||R*(0 - u_star)|| over one element.
        extra = jnp.float32(abs(R * (0.0 - u_star)))

    if not need_x and not need_u:
        return extra

    rows_x = T * B
    rows_u = 0
    M = 1
    if need_u:
        u = jnp.asarray(u)
        M = int(u.shape[-1])
        rows_u = 1
        for s in u.shape[:-1]:
            rows_u *= int(s)

    rows_needed = max(rows_x if need_x else 0, rows_u if need_u else 0)

    # Row-block sizing: sublane dense, multiple of 16 (bf16-safe), capped by data size.
    # 2048 rows * 128 padded lanes * 4 B ~= 1 MiB/buffer; double-buffered x+u stays
    # well under v7x's 32 MiB scoped VMEM default.
    rb = min(int(block_rows), _round_up(rows_needed, 16))
    rb = max(16, _round_up(rb, 16))
    blocks = _cdiv(rows_needed, rb)
    nc = 2 if blocks >= 2 else 1            # split the row range across v7x's 2 TCs
    nb = _cdiv(blocks, nc)
    r_pad = nc * nb * rb

    inputs = []
    in_specs = []
    if need_x:
        x2 = x.reshape(rows_x, D)
        if r_pad > rows_x:
            x2 = jnp.pad(x2, ((0, r_pad - rows_x), (0, 0)))
        xs = jnp.asarray(x_star).reshape(1, D).astype(jnp.float32)
        inputs += [xs, x2]
        in_specs += [
            pl.BlockSpec((1, D), lambda c, b: (0, 0)),
            pl.BlockSpec((rb, D), lambda c, b, _nb=nb: (c * _nb + b, 0)),
        ]
    if need_u:
        u2 = u.reshape(rows_u, M)
        if r_pad > rows_u:
            u2 = jnp.pad(u2, ((0, r_pad - rows_u), (0, 0)))
        inputs += [u2]
        in_specs += [pl.BlockSpec((rb, M), lambda c, b, _nb=nb: (c * _nb + b, 0))]

    kernel = functools.partial(
        _integral_cost_kernel,
        compute_state=(Q != 0.0),
        compute_term=(P != 0.0),
        compute_ctrl=need_u,
        u_star=u_star,
        rows_blk=rb,
        rows_x=rows_x,
        rows_u=rows_u,
        term_start=rows_x - B,
    )

    out = pl.pallas_call(
        kernel,
        out_shape=jax.ShapeDtypeStruct((nc, 8, 128), jnp.float32),
        grid_spec=pltpu.PrefetchScalarGridSpec(
            num_scalar_prefetch=0,
            grid=(nc, nb),
            in_specs=in_specs,
            out_specs=pl.BlockSpec((1, 8, 128), lambda c, b: (c, 0, 0)),
        ),
        compiler_params=pltpu.CompilerParams(
            dimension_semantics=("parallel", "arbitrary"),
            vmem_limit_bytes=32 * 1024 * 1024,
        ),
    )(*inputs)

    state_sum = jnp.sum(out[:, 0, 0])
    term_sum = jnp.sum(out[:, 1, 0])
    ctrl_sum = jnp.sum(out[:, 2, 0])

    cost = jnp.float32(0.0)
    if Q != 0.0:
        cost = cost + jnp.float32(abs(Q)) * state_sum / rows_x
    if P != 0.0:
        cost = cost + jnp.float32(abs(P)) * term_sum / B
    if need_u:
        cost = cost + jnp.float32(abs(R)) * ctrl_sum / rows_u
    return cost + extra


def integral_cost_ref(x, x_star, u, *, P=0.0, Q=1.0, R=0.0, u_star=0.0):
    """Pure-JAX reference mirroring the PyTorch forward exactly (f32 math)."""
    x = jnp.asarray(x, jnp.float32)
    u = jnp.asarray(u, jnp.float32)
    x_star = jnp.asarray(x_star, jnp.float32)
    c = jnp.mean(jnp.linalg.norm(P * (x[-1] - x_star), axis=-1))
    c = c + jnp.mean(jnp.linalg.norm(Q * (x - x_star), axis=-1))
    c = c + jnp.mean(jnp.linalg.norm(R * (u - u_star), axis=-1))
    return c


if __name__ == "__main__":
    key = jax.random.PRNGKey(0)
    kx, kxs, ku = jax.random.split(key, 3)

    # Case 1: module defaults (P=0, Q=1, R=0) -> only the state term; the u
    # tensor is never DMA'd into the kernel.
    T, B, D, M = 8, 4, 32, 8
    x = jax.random.normal(kx, (T, B, D), dtype=jnp.float32)
    x_star = jax.random.normal(kxs, (D,), dtype=jnp.float32)
    u = jax.random.normal(ku, (T, B, M), dtype=jnp.float32)

    c1 = jax.block_until_ready(integral_cost(x, x_star, u, P=0.0, Q=1.0, R=0.0))
    r1 = jax.block_until_ready(integral_cost_ref(x, x_star, u, P=0.0, Q=1.0, R=0.0))
    assert jnp.allclose(c1, r1, rtol=1e-5, atol=1e-5), (c1, r1)

    # Case 2: all three terms active.
    c2 = jax.block_until_ready(
        integral_cost(x, x_star, u, P=0.5, Q=1.0, R=0.1, u_star=0.3))
    r2 = jax.block_until_ready(
        integral_cost_ref(x, x_star, u, P=0.5, Q=1.0, R=0.1, u_star=0.3))
    assert jnp.allclose(c2, r2, rtol=1e-5, atol=1e-5), (c2, r2)

    # Case 3: multi-block / 2-chunk grid with row padding, terminal rows inside
    # an interior block, and a negative state weight (abs() factoring).
    T3, B3 = 40, 8
    x3 = jax.random.normal(jax.random.PRNGKey(1), (T3, B3, D), dtype=jnp.float32)
    u3 = jax.random.normal(jax.random.PRNGKey(2), (T3, B3, M), dtype=jnp.float32)
    c3 = jax.block_until_ready(
        integral_cost(x3, x_star, u3, P=2.0, Q=-0.5, R=1.5, u_star=-0.2,
                      block_rows=64))
    r3 = jax.block_until_ready(
        integral_cost_ref(x3, x_star, u3, P=2.0, Q=-0.5, R=1.5, u_star=-0.2))
    assert jnp.allclose(c3, r3, rtol=1e-5, atol=1e-5), (c3, r3)

    # Case 4: bf16 pass-through (bytes over HBM halved; upcast inside kernel).
    T4, B4 = 16, 8
    x4 = jax.random.normal(jax.random.PRNGKey(3), (T4, B4, D)).astype(jnp.bfloat16)
    u4 = jax.random.normal(jax.random.PRNGKey(4), (T4, B4, M)).astype(jnp.bfloat16)
    c4 = jax.block_until_ready(
        integral_cost(x4, x_star, u4, P=1.0, Q=1.0, R=0.5, block_rows=64))
    r4 = jax.block_until_ready(
        integral_cost_ref(x4, x_star, u4, P=1.0, Q=1.0, R=0.5))
    assert jnp.allclose(c4, r4, rtol=1e-4, atol=1e-4), (c4, r4)

    print("KERNEL_OK")
</pallas_src>

<mosaic_0001>
module attributes {stable_mosaic.version = 11 : i64} {
  func.func @_integral_cost_kernel(%arg0: i32, %arg1: i32, %arg2: memref<1x32xf32, #tpu.memory_space<vmem>>, %arg3: memref<32x32xf32, #tpu.memory_space<vmem>>, %arg4: memref<1x8x128xf32, #tpu.memory_space<vmem>>) attributes {dimension_semantics = [#tpu.dimension_semantics<parallel>, #tpu.dimension_semantics<arbitrary>], iteration_bounds = array<i64: 1, 1>, scalar_prefetch = 0 : i64, scratch_operands = 0 : i64, tpu.core_type = #tpu.core_type<tc>, window_params = [{pipeline_mode = #tpu.pipeline_mode<synchronous>, transform_indices = @transform_0, window_bounds = array<i64: 1, 32>}, {transform_indices = @transform_1, window_bounds = array<i64: 32, 32>}, {transform_indices = @transform_2, window_bounds = array<i64: 1, 8, 128>}]} {
    %c0_i32 = arith.constant 0 : i32
    %0 = arith.cmpi eq, %arg1, %c0_i32 : i32
    %1 = arith.extui %0 : i1 to i32
    %c0_i32_0 = arith.constant 0 : i32
    %2 = arith.cmpi ne, %1, %c0_i32_0 : i32
    scf.if %2 {
      %cst_16 = arith.constant 0.000000e+00 : f32
      %39 = vector.broadcast %cst_16 : f32 to vector<1x8x128xf32>
      %c0_17 = arith.constant 0 : index
      %c0_18 = arith.constant 0 : index
      %c0_19 = arith.constant 0 : index
      %40 = vector.load %arg4[%c0_17, %c0_18, %c0_19] : memref<1x8x128xf32, #tpu.memory_space<vmem>>, vector<1x8x128xf32>
      tpu.vector_store %arg4[%c0_17, %c0_18, %c0_19], %39 {strides = array<i32>} : memref<1x8x128xf32, #tpu.memory_space<vmem>>, vector<1x8x128xf32>,
    } else {
    }
    %c1_i32 = arith.constant 1 : i32
    %3 = arith.muli %arg0, %c1_i32 : i32
    %4 = arith.addi %3, %arg1 : i32
    %c32_i32 = arith.constant 32 : i32
    %5 = arith.muli %4, %c32_i32 : i32
    %6 = tpu.iota {dimensions = array<i32: 0>} : vector<32x1xi32>
    %7 = vector.broadcast %5 : i32 to vector<32x1xi32>
    %8 = arith.addi %6, %7 : vector<32x1xi32>
    %9 = tpu.iota {dimensions = array<i32: 0>} : vector<8x128xi32>
    %cst = arith.constant 0.000000e+00 : f32
    %10 = vector.broadcast %cst : f32 to vector<8x128xf32>
    %c0 = arith.constant 0 : index
    %c0_1 = arith.constant 0 : index
    %11 = vector.load %arg3[%c0, %c0_1] : memref<32x32xf32, #tpu.memory_space<vmem>>, vector<32x32xf32>
    %c0_2 = arith.constant 0 : index
    %c0_3 = arith.constant 0 : index
    %12 = vector.load %arg2[%c0_2, %c0_3] : memref<1x32xf32, #tpu.memory_space<vmem>>, vector<1x32xf32>
    %13 = vector.broadcast %12 : vector<1x32xf32> to vector<32x32xf32>
    %14 = arith.subf %11, %13 : vector<32x32xf32>
    %15 = arith.mulf %14, %14 : vector<32x32xf32>
    %cst_4 = arith.constant dense<0.000000e+00> : vector<32xf32>
    %16 = vector.multi_reduction <add>, %15, %cst_4 [1] : vector<32x32xf32> to vector<32xf32>
    %17 = vector.shape_cast %16 : vector<32xf32> to vector<32x1xf32>
    %18 = math.sqrt %17 : vector<32x1xf32>
    %c32_i32_5 = arith.constant 32 : i32
    %19 = vector.broadcast %c32_i32_5 : i32 to vector<32x1xi32>
    %20 = arith.cmpi slt, %8, %19 : vector<32x1xi32>
    %cst_6 = arith.constant 0.000000e+00 : f32
    %21 = vector.broadcast %cst_6 : f32 to vector<32x1xf32>
    %22 = arith.select %20, %18, %21 : vector<32x1xi1>, vector<32x1xf32>
    %23 = vector.shape_cast %22 : vector<32x1xf32> to vector<1x32x1xf32>
    %cst_7 = arith.constant dense<0.000000e+00> : vector<1xf32>
    %24 = vector.multi_reduction <add>, %23, %cst_7 [1, 2] : vector<1x32x1xf32> to vector<1xf32>
    %25 = vector.shape_cast %24 : vector<1xf32> to vector<1x1x1xf32>
    %26 = vector.extract %25[0, 0, 0] : f32 from vector<1x1x1xf32>
    %c0_i32_8 = arith.constant 0 : i32
    %27 = vector.broadcast %c0_i32_8 : i32 to vector<8x128xi32>
    %28 = arith.cmpi eq, %9, %27 : vector<8x128xi32>
    %cst_9 = arith.constant 0.000000e+00 : f32
    %29 = vector.broadcast %26 : f32 to vector<8x128xf32>
    %30 = vector.broadcast %cst_9 : f32 to vector<8x128xf32>
    %31 = arith.select %28, %29, %30 : vector<8x128xi1>, vector<8x128xf32>
    %32 = arith.addf %10, %31 : vector<8x128xf32>
    %c0_10 = arith.constant 0 : index
    %c0_11 = arith.constant 0 : index
    %c0_12 = arith.constant 0 : index
    %33 = vector.load %arg4[%c0_10, %c0_11, %c0_12] : memref<1x8x128xf32, #tpu.memory_space<vmem>>, vector<1x8x128xf32>
    %34 = vector.shape_cast %33 : vector<1x8x128xf32> to vector<8x128xf32>
    %35 = arith.addf %34, %32 : vector<8x128xf32>
    %c0_13 = arith.constant 0 : index
    %c0_14 = arith.constant 0 : index
    %c0_15 = arith.constant 0 : index
    %36 = vector.load %arg4[%c0_13, %c0_14, %c0_15] : memref<1x8x128xf32, #tpu.memory_space<vmem>>, vector<1x8x128xf32>
    %37 = vector.shape_cast %36 : vector<1x8x128xf32> to vector<8x128xf32>
    %38 = vector.shape_cast %35 : vector<8x128xf32> to vector<1x8x128xf32>
    tpu.vector_store %arg4[%c0_13, %c0_14, %c0_15], %38 {strides = array<i32>} : memref<1x8x128xf32, #tpu.memory_space<vmem>>, vector<1x8x128xf32>,
    return
  }
  func.func @transform_0(%arg0: i32, %arg1: i32) -> (i32, i32) {
    %c0_i32 = arith.constant 0 : i32
    %c0_i32_0 = arith.constant 0 : i32
    %c0_i32_1 = arith.constant 0 : i32
    return %c0_i32, %c0_i32_0 : i32, i32
  }
  func.func @transform_1(%arg0: i32, %arg1: i32) -> (i32, i32) {
    %c1_i32 = arith.constant 1 : i32
    %0 = arith.muli %arg0, %c1_i32 : i32
    %1 = arith.addi %0, %arg1 : i32
    %c0_i32 = arith.constant 0 : i32
    %c0_i32_0 = arith.constant 0 : i32
    return %1, %c0_i32 : i32, i32
  }
  func.func @transform_2(%arg0: i32, %arg1: i32) -> (i32, i32, i32) {
    %c0_i32 = arith.constant 0 : i32
    %c0_i32_0 = arith.constant 0 : i32
    %c0_i32_1 = arith.constant 0 : i32
    return %arg0, %c0_i32, %c0_i32_0 : i32, i32, i32
  }
}

</mosaic_0001>

<bundles_post_ra>
// kernel: tpu_custom_call.1
= control target key start
LH: loop header
LB: loop body
LE: loop exit
PB: predicated region body
PF: predicated region fallthrough
CT: control target
= control target key end

     0   :  { %7 = vsyncpa [#allocation3], 0  ;;  %s325_s0 = inlined_call_operand.hbm [shape: f32[1,32], index: 0, kind: input, shape index: {}]   ;;  %s326_s1 = inlined_call_operand.hbm [shape: f32[32,32], index: 1, kind: input, shape index: {}]   ;;  %s327_s2 = inlined_call_operand.hbm [shape: f32[1,8,128], index: 2, kind: output, shape index: {}]  }
   0x1   :  { %8 = vsyncpa [#allocation6], 0 }
   0x2   :  { %9 = vsyncpa [#allocation4], 0  ;;  %s258_s9 = smov [#allocation2]   ;;  %s259_s11 = smov [#allocation5]  }
   0x3   :  { %s16_s10 = sshll.u32 %s258_s9, 4  ;;  %s29_s12 = sshll.u32 %s259_s11, 4  ;;  %s17_s10 = int_to_ptr.vmem [resolvable:$true] %s16_s10  ;;  %s278_s12 = int_to_ptr.vmem [resolvable:$true] %s29_s12 }
   0x4   :  { %s186_s15 = scalar_lea.hbm %s325_s0, 16 }
   0x5   :  { %p187_p0 = scmp.ne.s32.totalorder %s325_s0, %s186_s15  ;;  %p190_p1 = scmp.lt.u32.totalorder %s186_s15, %s325_s0 }
   0x7   :  { %p192_p2 = pnand %p190_p1, %p187_p0 }
   0x9   :  { %195 = shalt.err (!%p192_p2)
}
   0xa   :  { %s196_s20 = scalar_lea.vmem %s17_s10, 16  ;;  %s200_s21 = scalar_lea.vmem %s17_s10, 32 }
   0xb   :  { %p197_p3 = scmp.ne.s32.totalorder %s17_s10, %s196_s20  ;;  %p201_p4 = scmp.lt.s32.totalorder %s17_s10, %s17_s10 }
   0xc   :  { %p202_p5 = scmp.lt.s32.totalorder %s200_s21, %s196_s20 }
   0xe   :  { %p203_p6 = por %p202_p5, %p201_p4 }
  0x10   :  { %p204_p7 = pnand %p203_p6, %p197_p3 }
  0x12   :  { %207 = shalt.err (!%p204_p7)
}
  0x13   :  { %19 = dma.hbm_to_vmem [thread:$0]  %s325_s0, 16, %s17_s10, [#allocation3]  }
  0x14   :  { %s208_s26 = scalar_lea.hbm %s326_s1, 512 }
  0x15   :  { %p209_p8 = scmp.ne.s32.totalorder %s326_s1, %s208_s26  ;;  %p212_p9 = scmp.lt.u32.totalorder %s208_s26, %s326_s1 }
  0x17   :  { %p214_p10 = pnand %p212_p9, %p209_p8 }
  0x19   :  { %217 = shalt.err (!%p214_p10)
}
  0x1a   :  { %s218_s3 = scalar_lea.vmem %s278_s12, 512  ;;  %p223_p12 = scmp.lt.s32.totalorder %s278_s12, %s278_s12 }
  0x1b   :  { %p219_p11 = scmp.ne.s32.totalorder %s278_s12, %s218_s3  ;;  %p224_p13 = scmp.lt.s32.totalorder %s218_s3, %s218_s3 }
  0x1d   :  { %p225_p0 = por %p224_p13, %p223_p12 }
  0x1f   :  { %p226_p1 = pnand %p225_p0, %p219_p11 }
  0x21   :  { %229 = shalt.err (!%p226_p1)
}
  0x22   :  { %s260_s0 = smov 128   ;;  %s261_s4 = smov 8  }
  0x23   :  { %35 = dma.hbm_to_vmem [thread:$0]  %s326_s1, 512, %s278_s12, [#allocation6], %s260_s0, %s260_s0, %s261_s4  }
  0x24   :  { %252 = dma.done.wait [#allocation3], 16  }
  0x25   :  { %253 = vsyncadd [#allocation3], 4294967280 }
  0x26   :  { %254 = dma.done.wait [#allocation6], 512  }
  0x27   :  { %255 = vsyncadd [#allocation6], 4294966784  ;;  %v63_v0 = vld [vmem:[#allocation5 + $0x10] sm:$0xff]  ;;  %v169_v1 = vld [vmem:[#allocation2] ss:$0 sm:$0xff]  ;;  %vm80_vm0 = vcmask 261120   ;;  %v51_v55 = vlaneseq }
  0x28   :  { %v61_v2 = vld [vmem:[#allocation5] sm:$0xff]  ;;  %v74_v3 = vsub.f32 %v63_v0, %v169_v1  ;;  %v64_v5 = vld [vmem:[#allocation5 + $0x18] sm:$0xff]  ;;  %v62_v6 = vld [vmem:[#allocation5 + $0x8] sm:$0xff]  ;;  %vm129_vm3 = vcmask 7168   ;;  %s262_s7 = smov [#allocation7]  }
  0x29   :  { %v72_v4 = vsub.f32 %v61_v2, %v169_v1  ;;  %v75_v7 = vsub.f32 %v64_v5, %v169_v1  ;;  %v73_v8 = vsub.f32 %v62_v6, %v169_v1  ;;  %v52_v56 = vshrl.u32 %v51_v55, 7  ;;  %s159_s8 = sshll.u32 %s262_s7, 4  ;;  %s160_s8 = int_to_ptr.vmem [resolvable:$true] %s159_s8 }
  0x2a   :  { %v78_v9 = vmul.f32 %v74_v3, %v74_v3  ;;  %s230_s9 = scalar_lea.vmem %s160_s8, 128  ;;  %p235_p3 = scmp.lt.s32.totalorder %s160_s8, %s160_s8 }
  0x2b   :  { %v76_v10 = vmul.f32 %v72_v4, %v72_v4  ;;  %v79_v11 = vmul.f32 %v75_v7, %v75_v7  ;;  %v77_v12 = vmul.f32 %v73_v8, %v73_v8  ;;  %vm146_vm10 = vcmp.eq.s32.totalorder %v52_v56, 0  ;;  %p231_p2 = scmp.ne.s32.totalorder %s160_s8, %s230_s9  ;;  %p236_p4 = scmp.lt.s32.totalorder %s230_s9, %s230_s9 }
  0x2c   :  { %v87_v13 = vsel %vm80_vm0, %v78_v9, 0.0 }
  0x2d   :  { %v81_v14 = vsel %vm80_vm0, %v76_v10, 0.0  ;;  %88 = vadd.xlane.f32.xlu1 %v87_v13  ;;  %v90_v15 = vsel %vm80_vm0, %v79_v11, 0.0  ;;  %v84_v16 = vsel %vm80_vm0, %v77_v12, 0.0  ;;  %p237_p5 = por %p236_p4, %p235_p3 }
  0x2e   :  { %82 = vadd.xlane.f32.xlu0 %v81_v14 }
  0x2f   :  { %p238_p6 = pnand %p237_p5, %p231_p2 }
  0x31   :  { %91 = vadd.xlane.f32.xlu1 %v90_v15 }
  0x32   :  { %85 = vadd.xlane.f32.xlu0 %v84_v16 }
  0xba   :  { %v89_v17 = vpop.xlane.xlu1 %88 }
  0xbb   :  { %v83_v18 = vpop.xlane.xlu0 %82  ;;  %178 = vrsqrt.f32 %v89_v17  ;;  %vm109_vm2 = vcmp.eq.f32.partialorder %v89_v17, inf  ;;  %v112_v32 = vand.u32 2147483648, %v89_v17  ;;  %vm111_vm8 = vcmp.eq.f32.partialorder %v89_v17, 0.0 }
  0xbc   :  { %180 = vrsqrt.f32 %v83_v18  ;;  %vm95_vm1 = vcmp.eq.f32.partialorder %v83_v18, inf  ;;  %v98_v28 = vand.u32 2147483648, %v83_v18  ;;  %vm97_vm4 = vcmp.eq.f32.partialorder %v83_v18, 0.0 }
  0xbe   :  { %v92_v19 = vpop.xlane.xlu1 %91 }
  0xbf   :  { %v86_v20 = vpop.xlane.xlu0 %85  ;;  %182 = vrsqrt.f32 %v92_v19  ;;  %vm116_vm6 = vcmp.eq.f32.partialorder %v92_v19, inf  ;;  %v119_v39 = vand.u32 2147483648, %v92_v19  ;;  %vm118_vm9 = vcmp.eq.f32.partialorder %v92_v19, 0.0 }
  0xc0   :  { %184 = vrsqrt.f32 %v86_v20  ;;  %vm102_vm5 = vcmp.eq.f32.partialorder %v86_v20, inf  ;;  %v105_v33 = vand.u32 2147483648, %v86_v20  ;;  %vm104_vm7 = vcmp.eq.f32.partialorder %v86_v20, 0.0 }
  0xc5   :  { %v179_v21 = vpop.eup %178 }
  0xc6   :  { %v181_v22 = vpop.eup %180  ;;  %v108_v23 = vmul.f32 %v179_v21, %v89_v17 }
  0xc7   :  { %v94_v24 = vmul.f32 %v181_v22, %v83_v18 }
  0xc8   :  { %v110_v31 = vsel %vm109_vm2, %v89_v17, %v108_v23 }
  0xc9   :  { %v183_v25 = vpop.eup %182  ;;  %v96_v26 = vsel %vm95_vm1, %v83_v18, %v94_v24  ;;  %v113_v38 = vsel %vm111_vm8, %v112_v32, %v110_v31 }
  0xca   :  { %v185_v27 = vpop.eup %184  ;;  %v115_v29 = vmul.f32 %v183_v25, %v92_v19  ;;  %v99_v34 = vsel %vm97_vm4, %v98_v28, %v96_v26  ;;  %v133_v44 = vsel %vm129_vm3, %v113_v38, 0.0 }
  0xcb   :  { %v101_v30 = vmul.f32 %v185_v27, %v86_v20  ;;  %v130_v40 = vsel %vm129_vm3, %v99_v34, 0.0 }
  0xcc   :  { %v117_v36 = vsel %vm116_vm6, %v92_v19, %v115_v29 }
  0xcd   :  { %v103_v35 = vsel %vm102_vm5, %v86_v20, %v101_v30  ;;  %v120_v42 = vsel %vm118_vm9, %v119_v39, %v117_v36 }
  0xce   :  { %v106_v37 = vsel %vm104_vm7, %v105_v33, %v103_v35  ;;  %v135_v46 = vsel %vm129_vm3, %v120_v42, 0.0 }
  0xcf   :  { %v131_v41 = vsel %vm129_vm3, %v106_v37, 0.0 }
  0xd0   :  { %v132_v43 = vadd.f32 %v131_v41, %v130_v40 }
  0xd2   :  { %v134_v45 = vadd.f32 %v133_v44, %v132_v43 }
  0xd4   :  { %v136_v47 = vadd.f32 %v135_v46, %v134_v45 }
  0xd6   :  { %137 = vadd.xlane.f32.xlu0 %v136_v47 }
 0x163   :  { %v138_v48 = vpop.xlane.xlu0 %137 }
 0x164   :  { %v139_v49 = vrot.slane %v138_v48, 4 }
 0x166   :  { %v140_v50 = vadd.f32 %v139_v49, %v138_v48 }
 0x168   :  { %v141_v51 = vrot.slane %v140_v50, 2 }
 0x16a   :  { %v142_v52 = vadd.f32 %v141_v51, %v140_v50 }
 0x16c   :  { %v143_v53 = vrot.slane %v142_v52, 1 }
 0x16e   :  { %v144_v54 = vadd.f32 %v143_v53, %v142_v52 }
 0x170   :  { %170 = vpush %v144_v54 }
 0x1a1   :  { %s171_s1 = spop %170 }
 0x1a2   :  { %v147_v57 = vstv %s171_s1 }
 0x1a3   :  { %v148_v58 = vsel %vm146_vm10, %v147_v57, 0.0 }
 0x1a4   :  { %152 = vst [vmem:[#allocation7] sm:$0xff] %v148_v58 }
 0x1a5   :  { %241 = shalt.err (!%p238_p6)
}
 0x1a6   :  { %s242_s12 = scalar_lea.hbm %s327_s2, 128 }
 0x1a7   :  { %p243_p7 = scmp.ne.s32.totalorder %s327_s2, %s242_s12  ;;  %p246_p8 = scmp.lt.u32.totalorder %s242_s12, %s327_s2 }
 0x1a9   :  { %p248_p9 = pnand %p246_p8, %p243_p7 }
 0x1ab   :  { %251 = shalt.err (!%p248_p9)
}
 0x1ac   :  { %162 = dma.vmem_to_hbm [thread:$0]  %s160_s8, 128, %s327_s2, [#allocation4]  }
 0x1ad   :  { %256 = dma.done.wait [#allocation4], 128  }
 0x1ae   :  { %257 = vsyncadd [#allocation4], 4294967168 }
 0x1af   :  { %166 = vsyncpa [#allocation3], 1 }
 0x1b0   :  { %167 = vsyncpa [#allocation6], 1 }
 0x1b1   :  { %168 = vsyncpa [#allocation4], 1 }

</bundles_post_ra>
